<compile_context>
chip_gen: v7x
topology: tpu7x:2x2x1
jax: 0.10.0
libtpu: 0.0.40
codegen_flags: <defaults>
</compile_context>

<pallas_src>
import functools

import jax
import jax.numpy as jnp
from jax.experimental import pallas as pl
from jax.experimental.pallas import tpu as pltpu

INPUT_SIZE = 28 * 28   # 784
NUM_CLASSES = 10
LANES = 128            # lane-dense padded class dimension


def _round_up(x, m):
    return (x + m - 1) // m * m


def _device_tuning():
    """Per-generation tile / VMEM-limit choice (from the perf review)."""
    kind = ""
    try:
        kind = jax.devices()[0].device_kind.lower()
    except Exception:
        pass
    if "v7" in kind:
        # v7x: 2 TensorCores, 64 MiB VMEM/TC, ~3.2 TB/s HBM.
        return dict(tile_m_max=4096, vmem_limit=48 << 20, two_cores=True)
    # v5e / v6e (and fallback): single TC.  64 MiB scoped limit keeps the
    # 2048-row tile fully double-buffered on v5e's default-16 MiB config.
    return dict(tile_m_max=2048, vmem_limit=64 << 20, two_cores=False)


_TUNING = None


def _get_tuning():
    global _TUNING
    if _TUNING is None:
        _TUNING = _device_tuning()
    return _TUNING


def _linear_kernel(x_ref, w_ref, b_ref, o_ref):
    # (TILE_M, 784) @ (784, 128) on the MXU, f32 accumulate, bias broadcast.
    x = x_ref[...]
    if x.dtype == jnp.bfloat16:
        # bf16 inputs: run the MXU in bf16 with f32 accumulation (no upcast pass).
        w = w_ref[...].astype(jnp.bfloat16)
    else:
        x = x.astype(jnp.float32)   # no-op for f32; upcasts e.g. uint8 pixels in VMEM
        w = w_ref[...]
    acc = jnp.dot(x, w, preferred_element_type=jnp.float32)
    o_ref[...] = acc + b_ref[...]


def pad_params(w, b):
    """Pad nn.Linear params (10,784)/(10,) to lane-dense (784,128)/(1,128).

    Call once and reuse the result: keeps the transpose/pad/scatter out of the
    per-forward-call path.
    """
    w_pad = jnp.zeros((INPUT_SIZE, LANES), jnp.float32)
    w_pad = w_pad.at[:, :NUM_CLASSES].set(jnp.asarray(w, jnp.float32).T)
    b_pad = jnp.zeros((1, LANES), jnp.float32)
    b_pad = b_pad.at[:, :NUM_CLASSES].set(
        jnp.asarray(b, jnp.float32).reshape(1, NUM_CLASSES))
    return w_pad, b_pad


@functools.partial(jax.jit, static_argnames=("tile_m_max", "vmem_limit", "two_cores"))
def _forward_padded(x2d, w_pad, b_pad, *, tile_m_max, vmem_limit, two_cores):
    n = x2d.shape[0]

    # Tile selection: multiple of 8 sublanes, capped at tile_m_max.  On 2-TC
    # chips (v7x) make sure the grid has >= 2 steps so both cores get work.
    n8 = _round_up(max(n, 1), 8)
    tm = min(tile_m_max, n8)
    if two_cores and n8 >= 16 and pl.cdiv(n, tm) < 2:
        tm = _round_up(pl.cdiv(n8, 2), 8)
    grid = (pl.cdiv(n, tm),)

    out = pl.pallas_call(
        _linear_kernel,
        out_shape=jax.ShapeDtypeStruct((n, LANES), jnp.float32),
        grid_spec=pl.GridSpec(
            grid=grid,
            in_specs=[
                pl.BlockSpec((tm, INPUT_SIZE), lambda i: (i, 0)),     # x tile
                pl.BlockSpec((INPUT_SIZE, LANES), lambda i: (0, 0)),  # W (VMEM-resident)
                pl.BlockSpec((1, LANES), lambda i: (0, 0)),           # bias (resident)
            ],
            out_specs=pl.BlockSpec((tm, LANES), lambda i: (i, 0)),
        ),
        compiler_params=pltpu.CompilerParams(
            dimension_semantics=("parallel",),
            vmem_limit_bytes=vmem_limit,
        ),
        cost_estimate=pl.CostEstimate(
            flops=2 * n * INPUT_SIZE * LANES,   # padded 128-lane matmul executed
            transcendentals=0,
            bytes_accessed=x2d.dtype.itemsize * n * INPUT_SIZE
                           + 4 * (n * LANES + INPUT_SIZE * LANES + LANES),
        ),
    )(x2d, w_pad, b_pad)

    return out[:, :NUM_CLASSES]


def mnist_model_forward(xb, w_pad, b_pad):
    """Pallas equivalent of MnistModel.forward.

    xb    : any shape flattening to (N, 784); f32 (bf16 / uint8 also accepted,
            upcast in-kernel, no extra HBM pass).
    w_pad : (784, 128) from pad_params
    b_pad : (1, 128)   from pad_params
    returns: (N, NUM_CLASSES) float32
    """
    x2d = xb.reshape(-1, INPUT_SIZE)   # glue reshape in plain JAX
    return _forward_padded(x2d, w_pad, b_pad, **_get_tuning())


def _reference(xb, w, b):
    x2d = xb.reshape(-1, INPUT_SIZE).astype(jnp.float32)
    return x2d @ w.T + b


if __name__ == "__main__":
    key = jax.random.PRNGKey(0)
    kx, kw, kb = jax.random.split(key, 3)

    # Deterministic parameter init mirroring nn.Linear's uniform(-1/sqrt(fan_in), ...).
    bound = 1.0 / (INPUT_SIZE ** 0.5)
    w = jax.random.uniform(kw, (NUM_CLASSES, INPUT_SIZE), jnp.float32,
                           minval=-bound, maxval=bound)
    b = jax.random.uniform(kb, (NUM_CLASSES,), jnp.float32,
                           minval=-bound, maxval=bound)
    w_pad, b_pad = pad_params(w, b)   # hoisted: built once, reused per call

    # Small MNIST-like batches (N, C=1, 28, 28); 13 exercises the boundary
    # (partial last block, no wrapper padding).
    for batch in (8, 13):
        x = jax.random.normal(kx, (batch, 1, 28, 28), dtype=jnp.float32)
        out = jax.block_until_ready(mnist_model_forward(x, w_pad, b_pad))
        ref = _reference(x, w, b)
        assert out.shape == (batch, NUM_CLASSES)
        assert jnp.allclose(out, ref, atol=1e-4, rtol=1e-4), \
            float(jnp.max(jnp.abs(out - ref)))

    print("KERNEL_OK")
</pallas_src>

<mosaic_0001>
module attributes {stable_mosaic.version = 11 : i64} {
  func.func @_linear_kernel(%arg0: i32, %arg1: memref<8x784xf32, #tpu.memory_space<vmem>>, %arg2: memref<784x128xf32, #tpu.memory_space<vmem>>, %arg3: memref<1x128xf32, #tpu.memory_space<vmem>>, %arg4: memref<8x128xf32, #tpu.memory_space<vmem>>) attributes {dimension_semantics = [#tpu.dimension_semantics<parallel>], iteration_bounds = array<i64: 1>, scalar_prefetch = 0 : i64, scratch_operands = 0 : i64, tpu.core_type = #tpu.core_type<tc>, window_params = [{transform_indices = @transform_0, window_bounds = array<i64: 8, 784>}, {pipeline_mode = #tpu.pipeline_mode<synchronous>, transform_indices = @transform_1, window_bounds = array<i64: 784, 128>}, {pipeline_mode = #tpu.pipeline_mode<synchronous>, transform_indices = @transform_2, window_bounds = array<i64: 1, 128>}, {transform_indices = @transform_3, window_bounds = array<i64: 8, 128>}]} {
    %c0 = arith.constant 0 : index
    %c0_0 = arith.constant 0 : index
    %0 = vector.load %arg1[%c0, %c0_0] : memref<8x784xf32, #tpu.memory_space<vmem>>, vector<8x784xf32>
    %c0_1 = arith.constant 0 : index
    %c0_2 = arith.constant 0 : index
    %1 = vector.load %arg2[%c0_1, %c0_2] : memref<784x128xf32, #tpu.memory_space<vmem>>, vector<784x128xf32>
    %cst = arith.constant dense<0.000000e+00> : vector<8x128xf32>
    %2 = tpu.matmul %0, %1, %cst {dimension_numbers = #tpu.dot_dimension_numbers<[1], [0], [0], [1], [0, 0, 1, 1], [], []>} : vector<8x784xf32>, vector<784x128xf32>, vector<8x128xf32> -> vector<8x128xf32>
    %c0_3 = arith.constant 0 : index
    %c0_4 = arith.constant 0 : index
    %3 = vector.load %arg3[%c0_3, %c0_4] : memref<1x128xf32, #tpu.memory_space<vmem>>, vector<1x128xf32>
    %4 = vector.broadcast %3 : vector<1x128xf32> to vector<8x128xf32>
    %5 = arith.addf %2, %4 : vector<8x128xf32>
    %c0_5 = arith.constant 0 : index
    %c0_6 = arith.constant 0 : index
    %6 = vector.load %arg4[%c0_5, %c0_6] : memref<8x128xf32, #tpu.memory_space<vmem>>, vector<8x128xf32>
    tpu.vector_store %arg4[%c0_5, %c0_6], %5 {strides = array<i32>} : memref<8x128xf32, #tpu.memory_space<vmem>>, vector<8x128xf32>,
    return
  }
  func.func @transform_0(%arg0: i32) -> (i32, i32) {
    %c0_i32 = arith.constant 0 : i32
    %c0_i32_0 = arith.constant 0 : i32
    return %arg0, %c0_i32 : i32, i32
  }
  func.func @transform_1(%arg0: i32) -> (i32, i32) {
    %c0_i32 = arith.constant 0 : i32
    %c0_i32_0 = arith.constant 0 : i32
    %c0_i32_1 = arith.constant 0 : i32
    return %c0_i32, %c0_i32_0 : i32, i32
  }
  func.func @transform_2(%arg0: i32) -> (i32, i32) {
    %c0_i32 = arith.constant 0 : i32
    %c0_i32_0 = arith.constant 0 : i32
    %c0_i32_1 = arith.constant 0 : i32
    return %c0_i32, %c0_i32_0 : i32, i32
  }
  func.func @transform_3(%arg0: i32) -> (i32, i32) {
    %c0_i32 = arith.constant 0 : i32
    %c0_i32_0 = arith.constant 0 : i32
    return %arg0, %c0_i32 : i32, i32
  }
}

</mosaic_0001>

<bundles_post_ra>
// kernel: _forward_padded.1
= control target key start
LH: loop header
LB: loop body
LE: loop exit
PB: predicated region body
PF: predicated region fallthrough
CT: control target
= control target key end

     0   :  { %8 = vsyncpa [#allocation3], 0  ;;  %s861_s0 = inlined_call_operand.hbm [shape: f32[8,784], index: 0, kind: input, shape index: {}]   ;;  %s862_s1 = inlined_call_operand.hbm [shape: f32[784,128], index: 1, kind: input, shape index: {}]   ;;  %s863_s2 = inlined_call_operand.hbm [shape: f32[1,128], index: 2, kind: input, shape index: {}]   ;;  %s864_s3 = inlined_call_operand.hbm [shape: f32[8,128], index: 3, kind: output, shape index: {}]  }
   0x1   :  { %9 = vsyncpa [#allocation6], 0 }
   0x2   :  { %10 = vsyncpa [#allocation4], 0  ;;  %s784_s12 = smov [#allocation5]   ;;  %s690_s16 = scalar_lea.hbm %s862_s1, 12544 }
   0x3   :  { %s26_s13 = sshll.u32 %s784_s12, 4  ;;  %p691_p0 = scmp.ne.s32.totalorder %s862_s1, %s690_s16  ;;  %s27_s13 = int_to_ptr.vmem [resolvable:$true] %s26_s13 }
   0x4   :  { %p694_p1 = scmp.lt.u32.totalorder %s690_s16, %s862_s1 }
   0x6   :  { %p696_p2 = pnand %p694_p1, %p691_p0 }
   0x8   :  { %699 = shalt.err (!%p696_p2)
}
   0x9   :  { %s700_s21 = scalar_lea.vmem %s27_s13, 12544  ;;  %p705_p4 = scmp.lt.s32.totalorder %s27_s13, %s27_s13 }
   0xa   :  { %p701_p3 = scmp.ne.s32.totalorder %s27_s13, %s700_s21  ;;  %p706_p5 = scmp.lt.s32.totalorder %s700_s21, %s700_s21 }
   0xc   :  { %p707_p6 = por %p706_p5, %p705_p4 }
   0xe   :  { %p708_p7 = pnand %p707_p6, %p701_p3 }
  0x10   :  { %711 = shalt.err (!%p708_p7)
}
  0x11   :  { %s785_s22 = smov 128   ;;  %s786_s23 = smov 8  }
  0x12   :  { %32 = dma.hbm_to_vmem [thread:$0]  %s862_s1, 12544, %s27_s13, [#allocation6], %s785_s22, %s785_s22, %s786_s23  }
  0x13   :  { %s787_s26 = smov [#allocation2]   ;;  %s788_s28 = smov [#allocation7]  }
  0x14   :  { %s17_s27 = sshll.u32 %s787_s26, 4  ;;  %s39_s29 = sshll.u32 %s788_s28, 4  ;;  %s18_s27 = int_to_ptr.vmem [resolvable:$true] %s17_s27  ;;  %s40_s29 = int_to_ptr.vmem [resolvable:$true] %s39_s29 }
  0x15   :  { %s712_s5 = scalar_lea.hbm %s861_s0, 896 }
  0x16   :  { %p713_p8 = scmp.ne.s32.totalorder %s861_s0, %s712_s5  ;;  %p716_p9 = scmp.lt.u32.totalorder %s712_s5, %s861_s0 }
  0x18   :  { %p718_p10 = pnand %p716_p9, %p713_p8 }
  0x1a   :  { %721 = shalt.err (!%p718_p10)
}
  0x1b   :  { %s722_s1 = scalar_lea.vmem %s18_s27, 896  ;;  %p727_p12 = scmp.lt.s32.totalorder %s18_s27, %s18_s27 }
  0x1c   :  { %p723_p11 = scmp.ne.s32.totalorder %s18_s27, %s722_s1  ;;  %p728_p13 = scmp.lt.s32.totalorder %s722_s1, %s722_s1 }
  0x1e   :  { %p729_p0 = por %p728_p13, %p727_p12 }
  0x20   :  { %p730_p1 = pnand %p729_p0, %p723_p11 }
  0x22   :  { %733 = shalt.err (!%p730_p1)
}
  0x23   :  { %20 = dma.hbm_to_vmem [thread:$0]  %s861_s0, 896, %s18_s27, [#allocation3]  }
  0x24   :  { %s734_s14 = scalar_lea.hbm %s863_s2, 16 }
  0x25   :  { %p735_p2 = scmp.ne.s32.totalorder %s863_s2, %s734_s14  ;;  %p738_p3 = scmp.lt.u32.totalorder %s734_s14, %s863_s2 }
  0x27   :  { %p740_p4 = pnand %p738_p3, %p735_p2 }
  0x29   :  { %743 = shalt.err (!%p740_p4)
}
  0x2a   :  { %s744_s19 = scalar_lea.vmem %s40_s29, 16  ;;  %s748_s20 = scalar_lea.vmem %s40_s29, 32 }
  0x2b   :  { %p745_p5 = scmp.ne.s32.totalorder %s40_s29, %s744_s19  ;;  %p749_p6 = scmp.lt.s32.totalorder %s40_s29, %s40_s29 }
  0x2c   :  { %p750_p7 = scmp.lt.s32.totalorder %s748_s20, %s744_s19 }
  0x2e   :  { %p751_p8 = por %p750_p7, %p749_p6 }
  0x30   :  { %p752_p9 = pnand %p751_p8, %p745_p5 }
  0x32   :  { %755 = shalt.err (!%p752_p9)
}
  0x33   :  { %42 = dma.hbm_to_vmem [thread:$0]  %s863_s2, 16, %s40_s29, [#allocation6]  }
  0x34   :  { %778 = dma.done.wait [#allocation3], 896  }
  0x35   :  { %779 = vsyncadd [#allocation3], 4294966400 }
  0x36   :  { %780 = dma.done.wait [#allocation6], 12560  }
  0x37   :  { %781 = vsyncadd [#allocation6], 4294954736  ;;  %v75_v0 = vld [vmem:[#allocation5 + $0x80] sm:$0xff]  ;;  %v76_v1 = vld [vmem:[#allocation5 + $0x88] sm:$0xff]  ;;  %vm790_vm0 = vmmov 0   ;;  %vm164_vm1 = vcmask 130048  }
  0x38   :  { %v59_v2 = vld [vmem:[#allocation5] sm:$0xff]  ;;  %v582_v3 = vpack.c.bf16 %v76_v1, %v75_v0  ;;  %v60_v4 = vld [vmem:[#allocation5 + $0x8] sm:$0xff]  ;;  %v77_v11 = vld [vmem:[#allocation5 + $0x90] sm:$0xff]  ;;  %s792_s2 = smov [#allocation8]  }
  0x39   :  { %v107_v5 = vld [vmem:[#allocation5 + $0x180] sm:$0xff]  ;;  %v108_v6 = vld [vmem:[#allocation5 + $0x188] sm:$0xff]  ;;  %v584_v7 = vpack.c.bf16 %v60_v4, %v59_v2  ;;  %v78_v13 = vld [vmem:[#allocation5 + $0x98] sm:$0xff]  ;;  %s455_s22 = sshll.u32 %s792_s2, 4  ;;  %s456_s22 = int_to_ptr.vmem [resolvable:$true] %s455_s22 }
  0x3a   :  { %v614_v8 = vpack.c.bf16 %v108_v6, %v107_v5  ;;  %v91_v9 = vld [vmem:[#allocation5 + $0x100] sm:$0xff]  ;;  %v92_v10 = vld [vmem:[#allocation5 + $0x108] sm:$0xff]  ;;  %583 = vmatprep.subr.bf16.mxu0 %v582_v3  ;;  %v61_v14 = vld [vmem:[#allocation5 + $0x10] sm:$0xff]  ;;  %v586_v16 = vpack.c.bf16 %v78_v13, %v77_v11  ;;  %s756_s23 = scalar_lea.vmem %s456_s22, 128  ;;  %p761_p11 = scmp.lt.s32.totalorder %s456_s22, %s456_s22 }
  0x3b   :  { %v616_v12 = vpack.c.bf16 %v92_v10, %v91_v9  ;;  %v62_v15 = vld [vmem:[#allocation5 + $0x18] sm:$0xff]  ;;  %585 = vmatpush3.bf16.msra.mxu0 %v584_v7  ;;  %v109_v18 = vld [vmem:[#allocation5 + $0x190] sm:$0xff]  ;;  %v79_v23 = vld [vmem:[#allocation5 + $0xa0] sm:$0xff]  ;;  %p757_p10 = scmp.ne.s32.totalorder %s456_s22, %s756_s23  ;;  %p762_p12 = scmp.lt.s32.totalorder %s756_s23, %s756_s23 }
  0x3c   :  { %615 = vmatprep.subr.bf16.mxu1 %v614_v8  ;;  %v588_v17 = vpack.c.bf16 %v62_v15, %v61_v14  ;;  %v110_v19 = vld [vmem:[#allocation5 + $0x198] sm:$0xff]  ;;  %v93_v20 = vld [vmem:[#allocation5 + $0x110] sm:$0xff]  ;;  %v80_v24 = vld [vmem:[#allocation5 + $0xa8] sm:$0xff]  ;;  %587 = vmatprep.subr.bf16.mxu0 %v586_v16 }
  0x3d   :  { %617 = vmatpush3.bf16.msra.mxu1 %v616_v12  ;;  %v618_v21 = vpack.c.bf16 %v110_v19, %v109_v18  ;;  %v94_v22 = vld [vmem:[#allocation5 + $0x118] sm:$0xff]  ;;  %v590_v26 = vpack.c.bf16 %v80_v24, %v79_v23  ;;  %v63_v27 = vld [vmem:[#allocation5 + $0x20] sm:$0xff]  ;;  %v64_v28 = vld [vmem:[#allocation5 + $0x28] sm:$0xff]  ;;  %p763_p13 = por %p762_p12, %p761_p11 }
  0x3e   :  { %v620_v25 = vpack.c.bf16 %v94_v22, %v93_v20  ;;  %v111_v29 = vld [vmem:[#allocation5 + $0x1a0] sm:$0xff]  ;;  %v112_v30 = vld [vmem:[#allocation5 + $0x1a8] sm:$0xff]  ;;  %v592_v33 = vpack.c.bf16 %v64_v28, %v63_v27  ;;  %v81_v35 = vld [vmem:[#allocation5 + $0xb0] sm:$0xff] }
  0x3f   :  { %619 = vmatprep.subr.bf16.mxu1 %v618_v21  ;;  %v95_v31 = vld [vmem:[#allocation5 + $0x120] sm:$0xff]  ;;  %v96_v32 = vld [vmem:[#allocation5 + $0x128] sm:$0xff]  ;;  %589 = vmatpush3.bf16.msra.mxu0 %v588_v17  ;;  %v622_v34 = vpack.c.bf16 %v112_v30, %v111_v29  ;;  %v82_v36 = vld [vmem:[#allocation5 + $0xb8] sm:$0xff]  ;;  %p764_p0 = pnand %p763_p13, %p757_p10 }
  0x40   :  { %v65_v37 = vld [vmem:[#allocation5 + $0x30] sm:$0xff]  ;;  %591 = vmatprep.subr.bf16.mxu0 %v590_v26  ;;  %v624_v38 = vpack.c.bf16 %v96_v32, %v95_v31  ;;  %v594_v39 = vpack.c.bf16 %v82_v36, %v81_v35  ;;  %v66_v40 = vld [vmem:[#allocation5 + $0x38] sm:$0xff]  ;;  %v83_v46 = vld [vmem:[#allocation5 + $0xc0] sm:$0xff] }
  0x41   :  { %621 = vmatpush3.bf16.msra.mxu1 %v620_v25  ;;  %v113_v41 = vld [vmem:[#allocation5 + $0x1b0] sm:$0xff]  ;;  %v114_v42 = vld [vmem:[#allocation5 + $0x1b8] sm:$0xff]  ;;  %v84_v47 = vld [vmem:[#allocation5 + $0xc8] sm:$0xff]  ;;  %v596_v48 = vpack.c.bf16 %v66_v40, %v65_v37 }
  0x42   :  { %623 = vmatprep.subr.bf16.mxu1 %v622_v34  ;;  %v626_v43 = vpack.c.bf16 %v114_v42, %v113_v41  ;;  %v97_v44 = vld [vmem:[#allocation5 + $0x130] sm:$0xff]  ;;  %v98_v45 = vld [vmem:[#allocation5 + $0x138] sm:$0xff]  ;;  %v115_v49 = vld [vmem:[#allocation5 + $0x1c0] sm:$0xff]  ;;  %v598_v52 = vpack.c.bf16 %v84_v47, %v83_v46 }
  0x43   :  { %593 = vmatpush3.bf16.msra.mxu0 %v592_v33  ;;  %v116_v50 = vld [vmem:[#allocation5 + $0x1c8] sm:$0xff]  ;;  %v628_v51 = vpack.c.bf16 %v98_v45, %v97_v44  ;;  %v67_v53 = vld [vmem:[#allocation5 + $0x40] sm:$0xff]  ;;  %v85_v58 = vld [vmem:[#allocation5 + $0xd0] sm:$0xff] }
  0x44   :  { %595 = vmatprep.subr.bf16.mxu0 %v594_v39  ;;  %v68_v54 = vld [vmem:[#allocation5 + $0x48] sm:$0xff]  ;;  %v99_v55 = vld [vmem:[#allocation5 + $0x140] sm:$0xff]  ;;  %v630_v56 = vpack.c.bf16 %v116_v50, %v115_v49  ;;  %v86_v59 = vld [vmem:[#allocation5 + $0xd8] sm:$0xff]  ;;  %v789_v50 = vmov 0.0|0.0  }
  0x45   :  { %625 = vmatpush3.bf16.msra.mxu1 %v624_v38  ;;  %v100_v57 = vld [vmem:[#allocation5 + $0x148] sm:$0xff]  ;;  %v117_v60 = vld [vmem:[#allocation5 + $0x1d0] sm:$0xff]  ;;  %v118_v61 = vld [vmem:[#allocation5 + $0x1d8] sm:$0xff]  ;;  %v600_v62 = vpack.c.bf16 %v68_v54, %v67_v53  ;;  %v602_v0 = vpack.c.bf16 %v86_v59, %v85_v58 }
  0x46   :  { %627 = vmatprep.subr.bf16.mxu1 %v626_v43  ;;  %v632_v63 = vpack.c.bf16 %v100_v57, %v99_v55  ;;  %v69_v1 = vld [vmem:[#allocation5 + $0x50] sm:$0xff]  ;;  %v70_v2 = vld [vmem:[#allocation5 + $0x58] sm:$0xff]  ;;  %v634_v4 = vpack.c.bf16 %v118_v61, %v117_v60  ;;  %v87_v6 = vld [vmem:[#allocation5 + $0xe0] sm:$0xff]  ;;  %v791_v60 = vmov 0.0  }
  0x47   :  { %597 = vmatpush3.bf16.msra.mxu0 %v596_v48  ;;  %v101_v3 = vld [vmem:[#allocation5 + $0x150] sm:$0xff]  ;;  %v102_v5 = vld [vmem:[#allocation5 + $0x158] sm:$0xff]  ;;  %v88_v7 = vld [vmem:[#allocation5 + $0xe8] sm:$0xff]  ;;  %v604_v10 = vpack.c.bf16 %v70_v2, %v69_v1 }
  0x48   :  { %599 = vmatprep.subr.bf16.mxu0 %v598_v52  ;;  %v119_v8 = vld [vmem:[#allocation5 + $0x1e0] sm:$0xff]  ;;  %v120_v9 = vld [vmem:[#allocation5 + $0x1e8] sm:$0xff]  ;;  %v53_v12 = vld [vmem:[#allocation2 + $0x8] sm:$0xff]  ;;  %v636_v13 = vpack.c.bf16 %v102_v5, %v101_v3  ;;  %v606_v14 = vpack.c.bf16 %v88_v7, %v87_v6 }
  0x49   :  { %629 = vmatpush3.bf16.msra.mxu1 %v628_v51  ;;  %v71_v11 = vld [vmem:[#allocation5 + $0x60] sm:$0xff]  ;;  %v72_v15 = vld [vmem:[#allocation5 + $0x68] sm:$0xff]  ;;  %v638_v18 = vpack.c.bf16 %v120_v9, %v119_v8  ;;  %v89_v19 = vld [vmem:[#allocation5 + $0xf0] sm:$0xff]  ;;  %232 = vmatprep.mubr.f32.mxu0 %v53_v12 }
  0x4a   :  { %631 = vmatprep.subr.bf16.mxu1 %v630_v56  ;;  %v103_v16 = vld [vmem:[#allocation5 + $0x160] sm:$0xff]  ;;  %v104_v17 = vld [vmem:[#allocation5 + $0x168] sm:$0xff]  ;;  %v90_v20 = vld [vmem:[#allocation5 + $0xf8] sm:$0xff]  ;;  %v608_v24 = vpack.c.bf16 %v72_v15, %v71_v11 }
  0x4b   :  { %601 = vmatpush3.bf16.msra.mxu0 %v600_v62  ;;  %v55_v21 = vld [vmem:[#allocation2 + $0x18] sm:$0xff]  ;;  %v121_v22 = vld [vmem:[#allocation5 + $0x1f0] sm:$0xff]  ;;  %v122_v23 = vld [vmem:[#allocation5 + $0x1f8] sm:$0xff]  ;;  %v640_v25 = vpack.c.bf16 %v104_v17, %v103_v16  ;;  %v610_v26 = vpack.c.bf16 %v90_v20, %v89_v19 }
  0x4c   :  { %603 = vmatprep.subr.bf16.mxu0 %v602_v0  ;;  %302 = vmatprep.mubr.f32.mxu1 %v55_v21  ;;  %v73_v27 = vld [vmem:[#allocation5 + $0x70] sm:$0xff]  ;;  %v74_v28 = vld [vmem:[#allocation5 + $0x78] sm:$0xff]  ;;  %v642_v30 = vpack.c.bf16 %v122_v23, %v121_v22  ;;  %v139_v32 = vld [vmem:[#allocation5 + $0x280] sm:$0xff] }
  0x4d   :  { %633 = vmatpush3.bf16.msra.mxu1 %v632_v63  ;;  %v105_v29 = vld [vmem:[#allocation5 + $0x170] sm:$0xff]  ;;  %v106_v31 = vld [vmem:[#allocation5 + $0x178] sm:$0xff]  ;;  %v140_v33 = vld [vmem:[#allocation5 + $0x288] sm:$0xff]  ;;  %v612_v34 = vpack.c.bf16 %v74_v28, %v73_v27 }
  0x4e   :  { %635 = vmatprep.subr.bf16.mxu1 %v634_v4  ;;  %v644_v35 = vpack.c.bf16 %v106_v31, %v105_v29  ;;  %v646_v36 = vpack.c.bf16 %v140_v33, %v139_v32  ;;  %v123_v37 = vld [vmem:[#allocation5 + $0x200] sm:$0xff]  ;;  %v124_v38 = vld [vmem:[#allocation5 + $0x208] sm:$0xff]  ;;  %v141_v39 = vld [vmem:[#allocation5 + $0x290] sm:$0xff] }
  0x4f   :  { %605 = vmatpush3.bf16.msra.mxu0 %v604_v10  ;;  %v142_v40 = vld [vmem:[#allocation5 + $0x298] sm:$0xff]  ;;  %v52_v41 = vld [vmem:[#allocation2] sm:$0xff]  ;;  %v648_v42 = vpack.c.bf16 %v124_v38, %v123_v37  ;;  %v125_v44 = vld [vmem:[#allocation5 + $0x210] sm:$0xff] }
  0x50   :  { %607 = vmatprep.subr.bf16.mxu0 %v606_v14  ;;  %v54_v43 = vld [vmem:[#allocation2 + $0x10] sm:$0xff]  ;;  %v650_v45 = vpack.c.bf16 %v142_v40, %v141_v39  ;;  %v143_v47 = vld [vmem:[#allocation5 + $0x2a0] sm:$0xff]  ;;  %v144_v48 = vld [vmem:[#allocation5 + $0x2a8] sm:$0xff] }
  0x51   :  { %637 = vmatpush3.bf16.msra.mxu1 %v636_v13  ;;  %v126_v46 = vld [vmem:[#allocation5 + $0x218] sm:$0xff]  ;;  %v57_v49 = vld [vmem:[#allocation2 + $0x28] sm:$0xff]  ;;  %v155_v51 = vld [vmem:[#allocation5 + $0x300] sm:$0xff]  ;;  %v654_v55 = vpack.c.bf16 %v144_v48, %v143_v47 }
  0x52   :  { %639 = vmatprep.subr.bf16.mxu1 %v638_v18  ;;  %v156_v52 = vld [vmem:[#allocation5 + $0x308] sm:$0xff]  ;;  %v652_v54 = vpack.c.bf16 %v126_v46, %v125_v44  ;;  %v127_v56 = vld [vmem:[#allocation5 + $0x220] sm:$0xff]  ;;  %v145_v58 = vld [vmem:[#allocation5 + $0x2b0] sm:$0xff] }
  0x53   :  { %609 = vmatpush3.bf16.msra.mxu0 %v608_v24  ;;  %v679_v53 = vpack.c.bf16 %v156_v52, %v155_v51  ;;  %v128_v57 = vld [vmem:[#allocation5 + $0x228] sm:$0xff]  ;;  %v146_v59 = vld [vmem:[#allocation5 + $0x2b8] sm:$0xff]  ;;  %v129_v0 = vld [vmem:[#allocation5 + $0x230] sm:$0xff] }
  0x54   :  { %611 = vmatprep.subr.bf16.mxu0 %v610_v26  ;;  %v58_v61 = vld [vmem:[#allocation2 + $0x30] sm:$0xff]  ;;  %v656_v62 = vpack.c.bf16 %v128_v57, %v127_v56  ;;  %v658_v63 = vpack.c.bf16 %v146_v59, %v145_v58  ;;  %v147_v2 = vld [vmem:[#allocation5 + $0x2c0] sm:$0xff]  ;;  %v148_v3 = vld [vmem:[#allocation5 + $0x2c8] sm:$0xff] }
  0x55   :  { %641 = vmatpush3.bf16.msra.mxu1 %v640_v25  ;;  %v130_v1 = vld [vmem:[#allocation5 + $0x238] sm:$0xff]  ;;  %v662_v5 = vpack.c.bf16 %v148_v3, %v147_v2  ;;  %v131_v6 = vld [vmem:[#allocation5 + $0x240] sm:$0xff]  ;;  %v132_v7 = vld [vmem:[#allocation5 + $0x248] sm:$0xff] }
  0x56   :  { %643 = vmatprep.subr.bf16.mxu1 %v642_v30  ;;  %v660_v4 = vpack.c.bf16 %v130_v1, %v129_v0  ;;  %v149_v8 = vld [vmem:[#allocation5 + $0x2d0] sm:$0xff]  ;;  %v150_v9 = vld [vmem:[#allocation5 + $0x2d8] sm:$0xff]  ;;  %v664_v10 = vpack.c.bf16 %v132_v7, %v131_v6  ;;  %v151_v14 = vld [vmem:[#allocation5 + $0x2e0] sm:$0xff] }
  0x57   :  { %613 = vmatpush3.bf16.msra.mxu0 %v612_v34  ;;  %v666_v11 = vpack.c.bf16 %v150_v9, %v149_v8  ;;  %v133_v12 = vld [vmem:[#allocation5 + $0x250] sm:$0xff]  ;;  %v134_v13 = vld [vmem:[#allocation5 + $0x258] sm:$0xff]  ;;  %v152_v15 = vld [vmem:[#allocation5 + $0x2e8] sm:$0xff] }
  0x58   :  { %647 = vmatprep.subr.bf16.mxu0 %v646_v36  ;;  %v668_v16 = vpack.c.bf16 %v134_v13, %v133_v12  ;;  %v670_v17 = vpack.c.bf16 %v152_v15, %v151_v14  ;;  %v135_v18 = vld [vmem:[#allocation5 + $0x260] sm:$0xff]  ;;  %v136_v19 = vld [vmem:[#allocation5 + $0x268] sm:$0xff]  ;;  %v153_v20 = vld [vmem:[#allocation5 + $0x2f0] sm:$0xff] }
  0x59   :  { %645 = vmatpush3.bf16.msra.mxu1 %v644_v35  ;;  %v154_v21 = vld [vmem:[#allocation5 + $0x2f8] sm:$0xff]  ;;  %v672_v22 = vpack.c.bf16 %v136_v19, %v135_v18  ;;  %v137_v24 = vld [vmem:[#allocation5 + $0x270] sm:$0xff]  ;;  %v56_v27 = vld [vmem:[#allocation2 + $0x20] sm:$0xff] }
  0x5a   :  { %678 = vmatprep.subr.bf16.mxu1 %v789_v50  ;;  %233 = vmatmul.mubr.f32.vlgmr.msra.gmra.mrb[0].mxu0 %v52_v41  ;;  %v674_v23 = vpack.c.bf16 %v154_v21, %v153_v20  ;;  %v138_v25 = vld [vmem:[#allocation5 + $0x278] sm:$0xff]  ;;  %v465_v29 = vld [vmem:[#allocation7] ss:$0 sm:$0xff] }
  0x5b   :  { %649 = vmatpush3.bf16.msra.mxu0 %v648_v42  ;;  %372 = vmatprep.mubr.f32.mxu0 %v57_v49  ;;  %v676_v26 = vpack.c.bf16 %v138_v25, %v137_v24 }
  0x5c   :  { %303 = vmatmul.mubr.f32.vlgmr.msra.gmra.mrb[0].mxu1 %v54_v43  ;;  %651 = vmatprep.subr.bf16.mxu0 %v650_v45 }
  0x5d   :  { %680 = vmatpush3.bf16.msra.mxu1 %v679_v53  ;;  %579 = vmatprep.mubr.msk.f32.mxu1 %vm790_vm0, %v791_v60 }
  0x5f   :  { %653 = vmatpush3.bf16.msra.mxu0 %v652_v54 }
  0x60   :  { %655 = vmatprep.subr.bf16.mxu0 %v654_v55  ;;  %580 = vmatmul.mubr.msk.f32.vlgmr.msra.gmra.mrb[2].mxu1 %vm164_vm1, %v58_v61 }
  0x63   :  { %657 = vmatpush3.bf16.msra.mxu0 %v656_v62 }
  0x64   :  { %659 = vmatprep.subr.bf16.mxu0 %v658_v63 }
  0x67   :  { %661 = vmatpush3.bf16.msra.mxu0 %v660_v4 }
  0x68   :  { %663 = vmatprep.subr.bf16.mxu0 %v662_v5 }
  0x6b   :  { %665 = vmatpush3.bf16.msra.mxu0 %v664_v10 }
  0x6c   :  { %667 = vmatprep.subr.bf16.mxu0 %v666_v11 }
  0x6f   :  { %669 = vmatpush3.bf16.msra.mxu0 %v668_v16 }
  0x70   :  { %671 = vmatprep.subr.bf16.mxu0 %v670_v17 }
  0x73   :  { %673 = vmatpush3.bf16.msra.mxu0 %v672_v22 }
  0x74   :  { %675 = vmatprep.subr.bf16.mxu0 %v674_v23 }
  0x77   :  { %677 = vmatpush3.bf16.msra.mxu0 %v676_v26 }
  0x7a   :  { %373 = vmatmul.mubr.f32.vlgmr.msra.gmra.mrb[2].mxu0 %v56_v27 }
 0x12d   :  { %v499_v28 = vpop.f32.mrb[0].mxu0 }
 0x12e   :  { %v500_v30 = vpop.f32.mrb[1].mxu0 }
 0x12f   :  { %v534_v31 = vpop.f32.mrb[0].mxu1  ;;  %v501_v32 = vadd.f32 %v500_v30, %v499_v28 }
 0x130   :  { %v535_v33 = vpop.f32.mrb[1].mxu1 }
 0x131   :  { %v536_v34 = vadd.f32 %v535_v33, %v534_v31  ;;  %v235_v35 = vadd.f32 %v501_v32, %v465_v29 }
 0x133   :  { %v305_v36 = vadd.f32 %v536_v34, %v235_v35  ;;  %v444_v37 = vpop.f32.mrb[2].mxu1 }
 0x134   :  { %v581_v38 = vpop.f32.mrb[3].mxu1 }
 0x14d   :  { %v569_v39 = vpop.f32.mrb[2].mxu0 }
 0x14e   :  { %v570_v40 = vpop.f32.mrb[3].mxu0 }
 0x14f   :  { %v571_v41 = vadd.f32 %v570_v40, %v569_v39 }
 0x151   :  { %v375_v42 = vadd.f32 %v571_v41, %v305_v36 }
 0x153   :  { %v445_v43 = vadd.f32 %v444_v37, %v375_v42 }
 0x155   :  { %448 = vst [vmem:[#allocation8] sm:$0xff] %v445_v43 }
 0x156   :  { %767 = shalt.err (!%p764_p0)
}
 0x157   :  { %s768_s26 = scalar_lea.hbm %s864_s3, 128 }
 0x158   :  { %p769_p1 = scmp.ne.s32.totalorder %s864_s3, %s768_s26  ;;  %p772_p2 = scmp.lt.u32.totalorder %s768_s26, %s864_s3 }
 0x15a   :  { %p774_p3 = pnand %p772_p2, %p769_p1 }
 0x15c   :  { %777 = shalt.err (!%p774_p3)
}
 0x15d   :  { %458 = dma.vmem_to_hbm [thread:$0]  %s456_s22, 128, %s864_s3, [#allocation4]  }
 0x15e   :  { %782 = dma.done.wait [#allocation4], 128  }
 0x15f   :  { %783 = vsyncadd [#allocation4], 4294967168 }
 0x160   :  { %462 = vsyncpa [#allocation3], 1 }
 0x161   :  { %463 = vsyncpa [#allocation6], 1 }
 0x162   :  { %464 = vsyncpa [#allocation4], 1 }

</bundles_post_ra>
